<compile_context>
chip_gen: v6e
topology: v6e:2x2x1
jax: 0.10.0
libtpu: 0.0.40
codegen_flags: <defaults>
</compile_context>

<pallas_src>
import jax
import jax.numpy as jnp
from jax.experimental import pallas as pl
from jax.experimental.pallas import tpu as pltpu

LANE = 128


def classifier_head_kernel(x_ref, wp_ref, bp_ref, wc_ref, out_ref):
    """Fused BERT pooler + classification head.

    Grid: (n_split, n_tiles_per_split) over pooler output columns.
      axis 0 ("parallel")  -> core split (v7x megacore), owns its own out block
      axis 1 ("arbitrary") -> column tiles accumulated into the resident block

    x_ref  : (B, H)    [CLS] hidden state, bf16 (same block every step)
    wp_ref : (H, tn)   pooler dense weight column tile, bf16
    bp_ref : (1, tn)   pooler dense bias tile, f32
    wc_ref : (1, tn)   cls_layer weight tile, f32 (nn.Linear(H,1).weight layout)
    out_ref: (B, 128)  lane-dense per-lane partial accumulator (first dim of the
                       (n_split, B, 128) output is squeezed via block_shape None)
    """
    j = pl.program_id(1)

    @pl.when(j == 0)
    def _init():
        out_ref[...] = jnp.zeros_like(out_ref)

    # Pooler dense on the MXU: bf16 operands, f32 accumulation.
    acc = jnp.dot(x_ref[...], wp_ref[...], preferred_element_type=jnp.float32)
    # Bias add + tanh in f32 (v5e VPU/EUP have no bf16 path).
    pooled = jnp.tanh(acc + bp_ref[...])                      # (B, tn) f32
    # Classifier projection (N=1): elementwise multiply by the cls weight...
    contrib = pooled * wc_ref[...]                            # (B, tn) f32

    # ...then accumulate per-lane partials only (lane-aligned VPU adds).  The
    # single cross-lane (XLU) reduction is done once in the wrapper instead of
    # once per grid step.
    tn = contrib.shape[-1]
    per_lane = contrib[:, :LANE]
    for t in range(1, tn // LANE):
        per_lane = per_lane + contrib[:, t * LANE:(t + 1) * LANE]
    out_ref[...] += per_lane


def _round_up(x, m):
    return ((x + m - 1) // m) * m


def _select_tiling(H_in, H_out, B):
    """Generation-aware column tile, core split and scoped-VMEM limit."""
    try:
        kind = jax.devices()[0].device_kind.lower()
    except Exception:  # pragma: no cover - e.g. interpret mode / no device
        kind = ""

    if "v7" in kind:
        # 64 MiB VMEM, 32 MiB default scoped limit; never collapse to a single
        # huge tile (2 x 32 MiB double-buffer would eat all of VMEM).
        budget, tn_cap, want_split, vmem_limit = 24 << 20, 1024, 2, 32 << 20
    elif "v6" in kind:
        # 128 MiB physical; raise the scoped limit and allow single-tile up to
        # H_out = 2048 to amortize the ~0.35 us/step grid overhead.
        budget, tn_cap, want_split, vmem_limit = 28 << 20, 2048, 1, 64 << 20
    else:
        # v5e / v5p / unknown: stay under the 16 MiB default scoped VMEM.
        budget, tn_cap, want_split, vmem_limit = 12 << 20, 512, 1, None

    tn = min(tn_cap, _round_up(H_out, LANE))
    tn = max(LANE, (tn // LANE) * LANE)

    def vmem_need(t):
        return (2 * H_in * t * 2        # w_pooler tile, bf16, double-buffered
                + 2 * B * H_in * 2      # x (constant block; counted x2 anyway)
                + 2 * 2 * t * 4         # bp + wc tiles, f32, double-buffered
                + 2 * B * LANE * 4)     # resident output accumulator

    while tn > LANE and vmem_need(tn) > budget:
        tn = max(LANE, ((tn // 2) // LANE) * LANE)

    n_tiles_total = pl.cdiv(H_out, tn)
    n_split = want_split if n_tiles_total >= want_split else 1
    h_out_pad = _round_up(H_out, n_split * tn)
    return tn, n_split, h_out_pad, vmem_limit


def init_params(key, vocab_size, hidden_size):
    k_emb, k_wp, k_bp, k_wc, k_bc = jax.random.split(key, 5)
    scale = 0.02
    return {
        "embedding": scale * jax.random.normal(
            k_emb, (vocab_size, hidden_size), jnp.float32),
        # bf16 in HBM: halves the dominant weight DMA, hits bf16 MXU peak.
        "w_pooler": (scale * jax.random.normal(
            k_wp, (hidden_size, hidden_size), jnp.float32)).astype(jnp.bfloat16),
        "b_pooler": scale * jax.random.normal(
            k_bp, (1, hidden_size), jnp.float32),
        # Stored (1, H) == PyTorch nn.Linear(H, 1).weight layout (lane-dense).
        "w_cls": scale * jax.random.normal(
            k_wc, (1, hidden_size), jnp.float32),
        "b_cls": scale * jax.random.normal(
            k_bc, (1, 1), jnp.float32),
    }


def albert_classifier_forward(input_ids, attn_masks, params, token_type_ids=None):
    """Mirrors AlbertClassifierOld.forward(input_ids, attn_masks, token_type_ids)."""
    # TODO(synk): the frozen pretrained ALBERT transformer encoder (attention +
    # FFN stack) is external checkpoint state; it is stood in for by a
    # deterministic embedding lookup.  The pooler + cls-head math is exact.
    del attn_masks, token_type_ids      # consumed only by the (stand-in) encoder

    emb = params["embedding"]                                  # (V, H)
    # Gather only the [CLS] row -- never materialize (B, S, H) activations.
    cls_hidden = emb[input_ids[:, 0]]                          # (B, H)
    B, H = cls_hidden.shape

    wp = params["w_pooler"]                                    # (H, H_out) bf16
    bp = params["b_pooler"]                                    # (1, H_out) f32
    wc = params["w_cls"]                                       # (1, H_out) f32
    H_out = wp.shape[1]

    tn, n_split, h_out_pad, vmem_limit = _select_tiling(H, H_out, B)
    ntps = h_out_pad // (n_split * tn)                         # tiles per split

    # Zero-pad the column dimension up to n_split * ntps * tn.  wc == 0 on the
    # padded tail guarantees those columns contribute exactly 0 to the logit.
    pad = h_out_pad - H_out
    if pad:
        wp = jnp.pad(wp, ((0, 0), (0, pad)))
        bp = jnp.pad(bp, ((0, 0), (0, pad)))
        wc = jnp.pad(wc, ((0, 0), (0, pad)))

    def col_idx(c, j):
        return (0, c * ntps + j)

    compiler_kwargs = dict(dimension_semantics=("parallel", "arbitrary"))
    if vmem_limit is not None:
        compiler_kwargs["vmem_limit_bytes"] = vmem_limit

    partials = pl.pallas_call(
        classifier_head_kernel,
        out_shape=jax.ShapeDtypeStruct((n_split, B, LANE), jnp.float32),
        grid=(n_split, ntps),
        in_specs=[
            pl.BlockSpec((B, H), lambda c, j: (0, 0)),         # x: full each step
            pl.BlockSpec((H, tn), col_idx),                    # w_pooler col tile
            pl.BlockSpec((1, tn), col_idx),                    # b_pooler tile
            pl.BlockSpec((1, tn), col_idx),                    # w_cls tile
        ],
        # Lane-dense (128-wide) output; same block across the column axis =>
        # resident accumulator in VMEM, one writeback per core-split value.
        out_specs=pl.BlockSpec((None, B, LANE), lambda c, j: (c, 0, 0)),
        compiler_params=pltpu.CompilerParams(**compiler_kwargs),
        cost_estimate=pl.CostEstimate(
            flops=2 * B * H * h_out_pad + 3 * B * h_out_pad,
            transcendentals=B * h_out_pad,
            bytes_accessed=(H * h_out_pad * 2          # w_pooler, bf16
                            + 2 * h_out_pad * 4        # b_pooler + w_cls, f32
                            + B * H * 2                # x, fetched once
                            + n_split * B * LANE * 4), # partial accumulators
        ),
    )(
        cls_hidden.astype(jnp.bfloat16),
        wp.astype(jnp.bfloat16),
        bp,
        wc,
    )

    # Epilogue (tiny XLA ops): combine core-split partials, reduce lanes once,
    # add the classifier bias.  Dropout(p=0.1) is identity at inference.
    logits = jnp.sum(partials, axis=(0, 2))[:, None] + params["b_cls"]
    return logits                                              # (B, 1)


if __name__ == "__main__":
    B, S, H, V = 2, 8, 32, 50

    key = jax.random.PRNGKey(0)
    k_params, k_ids = jax.random.split(key)

    params = init_params(k_params, vocab_size=V, hidden_size=H)
    input_ids = jax.random.randint(k_ids, (B, S), 0, V, dtype=jnp.int32)
    attn_masks = jnp.ones((B, S), dtype=jnp.float32)

    logits = albert_classifier_forward(input_ids, attn_masks, params)
    jax.block_until_ready(logits)

    # Pure-JAX reference of the pooler + cls head (same bf16 matmul precision,
    # f32 accumulation) to sanity-check the kernel.
    cls_hidden = params["embedding"][input_ids[:, 0]]
    pooled_ref = jnp.tanh(
        jnp.dot(cls_hidden.astype(jnp.bfloat16),
                params["w_pooler"],
                preferred_element_type=jnp.float32)
        + params["b_pooler"])
    logits_ref = (jnp.sum(pooled_ref * params["w_cls"], axis=-1, keepdims=True)
                  + params["b_cls"])
    assert logits.shape == (B, 1)
    assert jnp.allclose(logits, logits_ref, atol=1e-4, rtol=1e-3), \
        "kernel mismatch vs reference"

    print("KERNEL_OK")
</pallas_src>

<mosaic_0001>
module attributes {stable_mosaic.version = 11 : i64} {
  func.func @classifier_head_kernel(%arg0: i32, %arg1: i32, %arg2: memref<2x32xbf16, #tpu.memory_space<vmem>>, %arg3: memref<32x128xbf16, #tpu.memory_space<vmem>>, %arg4: memref<1x128xf32, #tpu.memory_space<vmem>>, %arg5: memref<1x128xf32, #tpu.memory_space<vmem>>, %arg6: memref<1x2x128xf32, #tpu.memory_space<vmem>>) attributes {dimension_semantics = [#tpu.dimension_semantics<parallel>, #tpu.dimension_semantics<arbitrary>], iteration_bounds = array<i64: 1, 1>, scalar_prefetch = 0 : i64, scratch_operands = 0 : i64, tpu.core_type = #tpu.core_type<tc>, window_params = [{pipeline_mode = #tpu.pipeline_mode<synchronous>, transform_indices = @transform_0, window_bounds = array<i64: 2, 32>}, {transform_indices = @transform_1, window_bounds = array<i64: 32, 128>}, {transform_indices = @transform_2, window_bounds = array<i64: 1, 128>}, {transform_indices = @transform_3, window_bounds = array<i64: 1, 128>}, {transform_indices = @transform_4, window_bounds = array<i64: 1, 2, 128>}]} {
    %c0_i32 = arith.constant 0 : i32
    %0 = arith.cmpi eq, %arg1, %c0_i32 : i32
    %1 = arith.extui %0 : i1 to i32
    %c0_i32_0 = arith.constant 0 : i32
    %2 = arith.cmpi ne, %1, %c0_i32_0 : i32
    scf.if %2 {
      %cst_14 = arith.constant 0.000000e+00 : f32
      %19 = vector.broadcast %cst_14 : f32 to vector<2x128xf32>
      %c0_15 = arith.constant 0 : index
      %c0_16 = arith.constant 0 : index
      %c0_17 = arith.constant 0 : index
      %20 = vector.load %arg6[%c0_15, %c0_16, %c0_17] : memref<1x2x128xf32, #tpu.memory_space<vmem>>, vector<1x2x128xf32>
      %21 = vector.shape_cast %20 : vector<1x2x128xf32> to vector<2x128xf32>
      %22 = vector.shape_cast %19 : vector<2x128xf32> to vector<1x2x128xf32>
      tpu.vector_store %arg6[%c0_15, %c0_16, %c0_17], %22 {strides = array<i32>} : memref<1x2x128xf32, #tpu.memory_space<vmem>>, vector<1x2x128xf32>,
    } else {
    }
    %c0 = arith.constant 0 : index
    %c0_1 = arith.constant 0 : index
    %3 = vector.load %arg2[%c0, %c0_1] : memref<2x32xbf16, #tpu.memory_space<vmem>>, vector<2x32xbf16>
    %c0_2 = arith.constant 0 : index
    %c0_3 = arith.constant 0 : index
    %4 = vector.load %arg3[%c0_2, %c0_3] : memref<32x128xbf16, #tpu.memory_space<vmem>>, vector<32x128xbf16>
    %cst = arith.constant dense<0.000000e+00> : vector<2x128xf32>
    %5 = tpu.matmul %3, %4, %cst {dimension_numbers = #tpu.dot_dimension_numbers<[1], [0], [0], [1], [0, 0, 1, 1], [], []>} : vector<2x32xbf16>, vector<32x128xbf16>, vector<2x128xf32> -> vector<2x128xf32>
    %c0_4 = arith.constant 0 : index
    %c0_5 = arith.constant 0 : index
    %6 = vector.load %arg4[%c0_4, %c0_5] : memref<1x128xf32, #tpu.memory_space<vmem>>, vector<1x128xf32>
    %7 = vector.broadcast %6 : vector<1x128xf32> to vector<2x128xf32>
    %8 = arith.addf %5, %7 : vector<2x128xf32>
    %9 = math.tanh %8 : vector<2x128xf32>
    %c0_6 = arith.constant 0 : index
    %c0_7 = arith.constant 0 : index
    %10 = vector.load %arg5[%c0_6, %c0_7] : memref<1x128xf32, #tpu.memory_space<vmem>>, vector<1x128xf32>
    %11 = vector.broadcast %10 : vector<1x128xf32> to vector<2x128xf32>
    %12 = arith.mulf %9, %11 : vector<2x128xf32>
    %c0_8 = arith.constant 0 : index
    %c0_9 = arith.constant 0 : index
    %c0_10 = arith.constant 0 : index
    %13 = vector.load %arg6[%c0_8, %c0_9, %c0_10] : memref<1x2x128xf32, #tpu.memory_space<vmem>>, vector<1x2x128xf32>
    %14 = vector.shape_cast %13 : vector<1x2x128xf32> to vector<2x128xf32>
    %15 = arith.addf %14, %12 : vector<2x128xf32>
    %c0_11 = arith.constant 0 : index
    %c0_12 = arith.constant 0 : index
    %c0_13 = arith.constant 0 : index
    %16 = vector.load %arg6[%c0_11, %c0_12, %c0_13] : memref<1x2x128xf32, #tpu.memory_space<vmem>>, vector<1x2x128xf32>
    %17 = vector.shape_cast %16 : vector<1x2x128xf32> to vector<2x128xf32>
    %18 = vector.shape_cast %15 : vector<2x128xf32> to vector<1x2x128xf32>
    tpu.vector_store %arg6[%c0_11, %c0_12, %c0_13], %18 {strides = array<i32>} : memref<1x2x128xf32, #tpu.memory_space<vmem>>, vector<1x2x128xf32>,
    return
  }
  func.func @transform_0(%arg0: i32, %arg1: i32) -> (i32, i32) {
    %c0_i32 = arith.constant 0 : i32
    %c0_i32_0 = arith.constant 0 : i32
    %c0_i32_1 = arith.constant 0 : i32
    return %c0_i32, %c0_i32_0 : i32, i32
  }
  func.func @transform_1(%arg0: i32, %arg1: i32) -> (i32, i32) {
    %c1_i32 = arith.constant 1 : i32
    %0 = arith.muli %arg0, %c1_i32 : i32
    %1 = arith.addi %0, %arg1 : i32
    %c0_i32 = arith.constant 0 : i32
    %c0_i32_0 = arith.constant 0 : i32
    return %c0_i32, %1 : i32, i32
  }
  func.func @transform_2(%arg0: i32, %arg1: i32) -> (i32, i32) {
    %c1_i32 = arith.constant 1 : i32
    %0 = arith.muli %arg0, %c1_i32 : i32
    %1 = arith.addi %0, %arg1 : i32
    %c0_i32 = arith.constant 0 : i32
    %c0_i32_0 = arith.constant 0 : i32
    return %c0_i32, %1 : i32, i32
  }
  func.func @transform_3(%arg0: i32, %arg1: i32) -> (i32, i32) {
    %c1_i32 = arith.constant 1 : i32
    %0 = arith.muli %arg0, %c1_i32 : i32
    %1 = arith.addi %0, %arg1 : i32
    %c0_i32 = arith.constant 0 : i32
    %c0_i32_0 = arith.constant 0 : i32
    return %c0_i32, %1 : i32, i32
  }
  func.func @transform_4(%arg0: i32, %arg1: i32) -> (i32, i32, i32) {
    %c0_i32 = arith.constant 0 : i32
    %c0_i32_0 = arith.constant 0 : i32
    %c0_i32_1 = arith.constant 0 : i32
    return %arg0, %c0_i32, %c0_i32_0 : i32, i32, i32
  }
}

</mosaic_0001>

<bundles_post_ra>
// kernel: tpu_custom_call.1
= control target key start
LH: loop header
LB: loop body
LE: loop exit
PB: predicated region body
PF: predicated region fallthrough
CT: control target
= control target key end

     0   :  { %9 = vsyncpa [#allocation3], 0  ;;  %s324_s0 = inlined_call_operand.hbm [shape: bf16[2,32], index: 0, kind: input, shape index: {}]   ;;  %s325_s1 = inlined_call_operand.hbm [shape: bf16[32,128], index: 1, kind: input, shape index: {}]   ;;  %s326_s2 = inlined_call_operand.vmem [shape: f32[1,128], index: 2, kind: input, shape index: {}]   ;;  %s327_s3 = inlined_call_operand.vmem [shape: f32[1,128], index: 3, kind: input, shape index: {}]   ;;  %s328_s4 = inlined_call_operand.hbm [shape: f32[1,2,128], index: 4, kind: output, shape index: {}]  }
   0x1   :  { %10 = vsyncpa [#allocation6], 0 }
   0x2   :  { %11 = vsyncpa [#allocation4], 0  ;;  %s277_s15 = smov [#allocation2]   ;;  %s278_s17 = smov [#allocation5]  }
   0x3   :  { %s18_s16 = sshll.u32 %s277_s15, 4  ;;  %s30_s18 = sshll.u32 %s278_s17, 4  ;;  %s19_s16 = int_to_ptr.vmem [resolvable:$true] %s18_s16  ;;  %s31_s18 = int_to_ptr.vmem [resolvable:$true] %s30_s18 }
   0x4   :  { %s219_s19 = scalar_lea.vmem %s19_s16, 16  ;;  %s223_s20 = scalar_lea.vmem %s19_s16, 32 }
   0x5   :  { %p220_p0 = scmp.ne.s32.totalorder %s19_s16, %s219_s19  ;;  %p224_p1 = scmp.lt.s32.totalorder %s19_s16, %s19_s16 }
   0x6   :  { %p225_p2 = scmp.lt.s32.totalorder %s223_s20, %s219_s19 }
   0x8   :  { %p226_p3 = por %p225_p2, %p224_p1 }
   0xa   :  { %p227_p4 = pnand %p226_p3, %p220_p0 }
   0xc   :  { %230 = shalt.err (!%p227_p4)
}
   0xd   :  { %21 = dma.hbm_to_vmem [thread:$0]  %s324_s0, 16, %s19_s16, [#allocation3]  }
   0xe   :  { %s239_s23 = scalar_lea.vmem %s31_s18, 256  ;;  %p244_p6 = scmp.lt.s32.totalorder %s31_s18, %s31_s18 }
   0xf   :  { %p240_p5 = scmp.ne.s32.totalorder %s31_s18, %s239_s23  ;;  %p245_p7 = scmp.lt.s32.totalorder %s239_s23, %s239_s23 }
  0x11   :  { %p246_p8 = por %p245_p7, %p244_p6 }
  0x13   :  { %p247_p9 = pnand %p246_p8, %p240_p5 }
  0x15   :  { %250 = shalt.err (!%p247_p9)
}
  0x16   :  { %s279_s24 = smov 64   ;;  %s280_s25 = smov 4  }
  0x17   :  { %36 = dma.hbm_to_vmem [thread:$0]  %s325_s1, 256, %s31_s18, [#allocation6], %s279_s24, %s279_s24, %s280_s25  }
  0x18   :  { %271 = dma.done.wait [#allocation3], 16  }
  0x19   :  { %272 = vsyncadd [#allocation3], 4294967280 }
  0x1a   :  { %273 = dma.done.wait [#allocation6], 256  }
  0x1b   :  { %274 = vsyncadd [#allocation6], 4294967040  ;;  %v281_v0 = vmov 0.0   ;;  %vm282_vm0 = vmmov 0   ;;  %v207_v1 = vld [vmem:[#allocation5 + $0x8] sm:$0xff]   ;;  %v208_v2 = vld [vmem:[#allocation5] sm:$0xff]  }
  0x1c   :  { %192 = vmatprep.subr.bf16.mxu0 %v281_v0  ;;  %81 = vst [vmem:[#allocation7] sm:$0x3] %v281_v0  ;;  %196 = vmatprep.mubr.msk.bf16.mxu0 %vm282_vm0, %v281_v0  ;;  %v82_v3 = vld [vmem:[#allocation2] sm:$0x1]  ;;  %vm106_vm1 = vcmask 261120   ;;  %s283_s30 = smov [#allocation7]  }
  0x1d   :  { %193 = vmatpush3.bf16.msra.mxu0 %v207_v1  ;;  %v184_v4 = vld [vmem:[%s326_s2] ss:$0 sm:$0xff]  ;;  %s168_s5 = sshll.u32 %s283_s30, 4  ;;  %s169_s5 = int_to_ptr.vmem [resolvable:$true] %s168_s5 }
  0x1e   :  { %194 = vmatprep.subr.bf16.mxu0 %v281_v0  ;;  %v188_v10 = vld [vmem:[%s327_s3] ss:$0 sm:$0xff]  ;;  %s251_s6 = scalar_lea.vmem %s169_s5, 32  ;;  %p256_p11 = scmp.lt.s32.totalorder %s169_s5, %s169_s5 }
  0x1f   :  { %p252_p10 = scmp.ne.s32.totalorder %s169_s5, %s251_s6  ;;  %p257_p12 = scmp.lt.s32.totalorder %s251_s6, %s251_s6 }
  0x21   :  { %195 = vmatpush3.bf16.msra.mxu0 %v208_v2  ;;  %p258_p13 = por %p257_p12, %p256_p11 }
  0x23   :  { %v159_v12 = vld [vmem:[#allocation7] sm:$0x3]  ;;  %p259_p0 = pnand %p258_p13, %p252_p10 }
  0x24   :  { %197 = vmatmul.mubr.msk.bf16.vlgmr.msra.gmra.mxu0 %vm106_vm1, %v82_v3 }
  0xe4   :  { %v144_v5 = vpop.f32.mrf.mxu0 }
  0xe5   :  { %v145_v6 = vadd.f32 %v184_v4, %v144_v5 }
  0xe6   :  { %v198_v7 = vpop.f32.mrf.mxu0 }
  0xe7   :  { %209 = vtanh.f32 %v145_v6 }
  0xe8   :  { %v147_v8 = vpop.f32.mrf.mxu0 }
  0xea   :  { %v199_v9 = vpop.f32.mrf.mxu0 }
  0xf4   :  { %v210_v11 = vpop.eup %209 }
  0xf5   :  { %v158_v13 = vmul.f32 %v210_v11, %v188_v10 }
  0xf7   :  { %v160_v14 = vadd.f32 %v159_v12, %v158_v13 }
  0xf9   :  { %161 = vst [vmem:[#allocation7] sm:$0x3] %v160_v14 }
  0xfa   :  { %262 = shalt.err (!%p259_p0)
}
  0xfb   :  { %171 = dma.vmem_to_hbm [thread:$0]  %s169_s5, 32, %s328_s4, [#allocation4]  }
  0xfc   :  { %275 = dma.done.wait [#allocation4], 32  }
  0xfd   :  { %276 = vsyncadd [#allocation4], 4294967264 }
  0xfe   :  { %175 = vsyncpa [#allocation3], 1 }
  0xff   :  { %176 = vsyncpa [#allocation6], 1 }
 0x100   :  { %177 = vsyncpa [#allocation4], 1 }

</bundles_post_ra>
